<compile_context>
chip_gen: v6e
topology: v6e:2x2x1
jax: 0.10.0
libtpu: 0.0.40
codegen_flags: <defaults>
</compile_context>

<pallas_src>
import functools

import jax
import jax.numpy as jnp
from jax.experimental import pallas as pl
from jax.experimental.pallas import tpu as pltpu


_PALLAS_MIN_SIZE = 65536          # elements; below this, plain jnp is faster
_LANE_N_MAX = 512                 # lane-dense slab width (multiple of 128)
_SUM_TILE_M_MAX = 2048            # up to 4 MiB f32 per operand per grid step
_ELEM_TILE_M_MAX = 1024           # 4 streams on the 'none' path -> 2 MiB blocks
_VMEM_HEADROOM = 16 << 20
_VMEM_CAP = 48 << 20


# ---------------------------------------------------------------------------
# Kernels
# ---------------------------------------------------------------------------
def _smooth_l1(p, t, beta):
    diff = jnp.abs(p - t)
    if beta > 0:
        return jnp.where(diff < beta, diff * diff * (0.5 / beta), diff - 0.5 * beta)
    return diff


def _sum_kernel(*refs, beta, has_weight, inner_axis):
    """Accumulate (weighted) smooth-L1 loss into a resident (1,8,LANE_N) block."""
    if has_weight:
        pred_ref, target_ref, weight_ref, out_ref = refs
    else:
        pred_ref, target_ref, out_ref = refs
        weight_ref = None

    @pl.when(pl.program_id(inner_axis) == 0)
    def _():
        out_ref[...] = jnp.zeros_like(out_ref)

    p = pred_ref[...].astype(jnp.float32)
    t = target_ref[...].astype(jnp.float32)
    loss = _smooth_l1(p, t, beta)
    if has_weight:
        loss = loss * weight_ref[...].astype(jnp.float32)

    tm, ln = loss.shape
    # tm is a multiple of 8 by construction -> pure VPU vreg adds, no per-step
    # cross-lane XLU reduce.
    partial = loss.reshape(tm // 8, 8, ln).sum(axis=0)
    out_ref[...] += partial[None]


def _elem_kernel(*refs, beta, has_weight):
    """Elementwise (reduction='none') smooth-L1 loss on a lane-dense slab."""
    if has_weight:
        pred_ref, target_ref, weight_ref, out_ref = refs
    else:
        pred_ref, target_ref, out_ref = refs
        weight_ref = None

    p = pred_ref[...].astype(jnp.float32)
    t = target_ref[...].astype(jnp.float32)
    loss = _smooth_l1(p, t, beta)
    if has_weight:
        loss = loss * weight_ref[...].astype(jnp.float32)
    out_ref[...] = loss.astype(out_ref.dtype)


# ---------------------------------------------------------------------------
# Geometry helpers
# ---------------------------------------------------------------------------
def _round_up(x, m):
    return ((x + m - 1) // m) * m


def _no_pad_geometry(size, lane_n_max, tile_m_max, rows_mult8):
    """Padding-free slab geometry (lane_n, tile_m, rows, num_blocks) or None."""
    if size % 128 != 0:
        return None
    ln_cap = min(lane_n_max, size)
    ln_cap -= ln_cap % 128
    for ln in range(ln_cap, 0, -128):
        if size % ln != 0:
            continue
        rows = size // ln
        if rows <= tile_m_max and (not rows_mult8 or rows % 8 == 0):
            return ln, rows, rows, 1          # single full-extent block
        if rows % 8 == 0:
            tm_cap = min(tile_m_max, rows)
            tm_cap -= tm_cap % 8
            for tm in range(tm_cap, 0, -8):
                if rows % tm == 0:
                    if tm >= 64:              # don't accept tiny blocks
                        return ln, tm, rows, rows // tm
                    break
    return None


def _padded_geometry(size, lane_n_max, tile_m_max):
    lane_n = min(lane_n_max, _round_up(size, 128))
    rows = pl.cdiv(size, lane_n)
    tile_m = min(tile_m_max, _round_up(rows, 8))
    num_blocks = pl.cdiv(rows, tile_m)
    return lane_n, tile_m, num_blocks * tile_m, num_blocks


def _slab_geometry(size, lane_n_max, tile_m_max, rows_mult8):
    geo = _no_pad_geometry(size, lane_n_max, tile_m_max, rows_mult8)
    if geo is not None:
        return geo + (False,)
    return _padded_geometry(size, lane_n_max, tile_m_max) + (True,)


def _to_slab(x, lane_n, m_rows):
    """Flatten to 1D, zero-pad only if needed, reshape to (m_rows, lane_n)."""
    flat = x.reshape(-1)
    total = m_rows * lane_n
    if flat.shape[0] != total:
        flat = jnp.pad(flat, (0, total - flat.shape[0]))
    return flat.reshape(m_rows, lane_n)


def _num_cores_hint():
    """2 for v7x-like (2 TensorCores/chip), else 1 (v5e/v6e single TC)."""
    try:
        kind = jax.devices()[0].device_kind.lower()
    except Exception:
        return 1
    return 2 if ("v7" in kind or "7x" in kind) else 1


def _vmem_limit(block_bytes_total):
    return int(min(2 * block_bytes_total + _VMEM_HEADROOM, _VMEM_CAP))


# ---------------------------------------------------------------------------
# Pallas wrappers
# ---------------------------------------------------------------------------
def _pallas_loss_sum(pred, target, weight, beta):
    size = pred.size
    lane_n, tile_m, m_rows, num_blocks, _ = _slab_geometry(
        size, _LANE_N_MAX, _SUM_TILE_M_MAX, rows_mult8=True)

    has_weight = weight is not None
    operands = [_to_slab(pred, lane_n, m_rows), _to_slab(target, lane_n, m_rows)]
    if has_weight:
        operands.append(_to_slab(weight, lane_n, m_rows))

    # Generation-aware core split: only shard the leading axis on multi-TC
    # chips, and only when the split is exact (never adds pad rows).
    cores = _num_cores_hint()
    c = cores if (cores > 1 and num_blocks % cores == 0
                  and num_blocks >= 2 * cores) else 1
    inner = num_blocks // c

    if c > 1:
        grid = (c, inner)
        in_idx = lambda ci, ii: (ci * inner + ii, 0)
        out_idx = lambda ci, ii: (ci, 0, 0)
        # NOTE: plain "parallel" is the safe choice; CORE_PARALLEL could be
        # tried on v7x after profiling confirms it lowers for this grid spec.
        semantics = ("parallel", "arbitrary")
        inner_axis = 1
    else:
        grid = (num_blocks,)
        in_idx = lambda ii: (ii, 0)
        out_idx = lambda ii: (0, 0, 0)
        semantics = ("arbitrary",)
        inner_axis = 0

    row_spec = pl.BlockSpec((tile_m, lane_n), in_idx)
    out_spec = pl.BlockSpec((1, 8, lane_n), out_idx)

    block_bytes = sum(tile_m * lane_n * op.dtype.itemsize for op in operands)
    block_bytes += 8 * lane_n * 4
    in_bytes = sum(int(op.size) * op.dtype.itemsize for op in operands)
    cost = pl.CostEstimate(flops=6 * int(size), transcendentals=0,
                           bytes_accessed=in_bytes + c * 8 * lane_n * 4)

    partials = pl.pallas_call(
        functools.partial(_sum_kernel, beta=beta, has_weight=has_weight,
                          inner_axis=inner_axis),
        out_shape=jax.ShapeDtypeStruct((c, 8, lane_n), jnp.float32),
        grid_spec=pltpu.PrefetchScalarGridSpec(
            num_scalar_prefetch=0,
            grid=grid,
            in_specs=[row_spec] * len(operands),
            out_specs=out_spec,
        ),
        compiler_params=pltpu.CompilerParams(
            dimension_semantics=semantics,
            vmem_limit_bytes=_vmem_limit(block_bytes)),
        cost_estimate=cost,
    )(*operands)
    # Tiny final reduce of the per-core / per-lane partials in XLA.
    return jnp.sum(partials)


def _pallas_loss_elem(pred, target, weight, beta):
    size = pred.size
    lane_n, tile_m, m_rows, num_blocks, padded = _slab_geometry(
        size, _LANE_N_MAX, _ELEM_TILE_M_MAX, rows_mult8=False)

    has_weight = weight is not None
    operands = [_to_slab(pred, lane_n, m_rows), _to_slab(target, lane_n, m_rows)]
    if has_weight:
        operands.append(_to_slab(weight, lane_n, m_rows))
    out_dtype = (jnp.result_type(pred.dtype, weight.dtype)
                 if has_weight else pred.dtype)

    row_spec = pl.BlockSpec((tile_m, lane_n), lambda i: (i, 0))

    out_itemsize = jnp.dtype(out_dtype).itemsize
    block_bytes = sum(tile_m * lane_n * op.dtype.itemsize for op in operands)
    block_bytes += tile_m * lane_n * out_itemsize
    in_bytes = sum(int(op.size) * op.dtype.itemsize for op in operands)
    cost = pl.CostEstimate(flops=6 * int(size), transcendentals=0,
                           bytes_accessed=in_bytes + m_rows * lane_n * out_itemsize)

    out = pl.pallas_call(
        functools.partial(_elem_kernel, beta=beta, has_weight=has_weight),
        out_shape=jax.ShapeDtypeStruct((m_rows, lane_n), out_dtype),
        grid_spec=pltpu.PrefetchScalarGridSpec(
            num_scalar_prefetch=0,
            grid=(num_blocks,),
            in_specs=[row_spec] * len(operands),
            out_specs=row_spec,
        ),
        compiler_params=pltpu.CompilerParams(
            dimension_semantics=("parallel",),
            vmem_limit_bytes=_vmem_limit(block_bytes)),
        cost_estimate=cost,
    )(*operands)

    if padded:
        # Only non-128-aligned sizes pay this extra output copy.
        return out.reshape(-1)[:size].reshape(pred.shape)
    return out.reshape(pred.shape)


# ---------------------------------------------------------------------------
# Small-input (pure jnp) fallback
# ---------------------------------------------------------------------------
def _jax_loss_elem(pred, target, weight, beta):
    loss = _smooth_l1(pred.astype(jnp.float32), target.astype(jnp.float32), beta)
    if weight is not None:
        loss = loss * weight.astype(jnp.float32)
        return loss.astype(jnp.result_type(pred.dtype, weight.dtype))
    return loss.astype(pred.dtype)


def _jax_loss_sum(pred, target, weight, beta):
    loss = _smooth_l1(pred.astype(jnp.float32), target.astype(jnp.float32), beta)
    if weight is not None:
        loss = loss * weight.astype(jnp.float32)
    return jnp.sum(loss)


# ---------------------------------------------------------------------------
# Module
# ---------------------------------------------------------------------------
class LinesL1Loss:
    """JAX/Pallas port of the PyTorch LinesL1Loss module (forward only)."""

    def __init__(self, reduction='mean', loss_weight=1.0, beta=0.5):
        self.reduction = reduction
        self.loss_weight = loss_weight
        self.beta = beta

    def __call__(self, pred, target, weight=None, avg_factor=None,
                 reduction_override=None):
        assert reduction_override in (None, 'none', 'mean', 'sum')
        reduction = reduction_override if reduction_override else self.reduction

        w_scalar = None
        w_full = None
        if weight is not None:
            weight = jnp.asarray(weight)
            if weight.size == 1:
                # Loss is linear in the weight -> fold a scalar weight in after
                # the kernel instead of streaming a full pred-sized operand.
                w_scalar = weight.reshape(()).astype(jnp.float32)
            elif weight.shape == pred.shape:
                w_full = weight
            else:
                # TODO(synk): per-row broadcast weights are still materialised
                # to pred's shape (one extra HBM stream); an in-kernel
                # broadcast needs a slab layout keyed on the leading dims.
                w_full = jnp.broadcast_to(weight, pred.shape)

        use_pallas = pred.size >= _PALLAS_MIN_SIZE

        if reduction == 'none':
            # NOTE: avg_factor is ignored for 'none' (matches mmdet).
            if use_pallas:
                loss = _pallas_loss_elem(pred, target, w_full, self.beta)
            else:
                loss = _jax_loss_elem(pred, target, w_full, self.beta)
            if w_scalar is not None:
                loss = loss * w_scalar
        else:
            if reduction == 'sum' and avg_factor is not None:
                # Matches mmdet's weight_reduce_loss behaviour.
                raise ValueError('avg_factor can not be used with reduction="sum"')
            if use_pallas:
                s = _pallas_loss_sum(pred, target, w_full, self.beta)
            else:
                s = _jax_loss_sum(pred, target, w_full, self.beta)
            if w_scalar is not None:
                s = s * w_scalar
            if reduction == 'mean':
                denom = (jnp.float32(pred.size) if avg_factor is None
                         else jnp.asarray(avg_factor, jnp.float32))
                loss = s / denom
            else:  # 'sum'
                loss = s

        num_points = pred.shape[-1] // 2
        loss = loss / num_points
        return loss * self.loss_weight


# ---------------------------------------------------------------------------
# Pure-JAX reference and self-test
# ---------------------------------------------------------------------------
def _reference(pred, target, weight, beta, reduction, loss_weight,
               avg_factor=None):
    diff = jnp.abs(pred.astype(jnp.float32) - target.astype(jnp.float32))
    if beta > 0:
        loss = jnp.where(diff < beta, 0.5 * diff * diff / beta, diff - 0.5 * beta)
    else:
        loss = diff
    if weight is not None:
        loss = loss * jnp.broadcast_to(weight, pred.shape).astype(jnp.float32)
    if reduction == 'mean':
        loss = jnp.mean(loss) if avg_factor is None else jnp.sum(loss) / avg_factor
    elif reduction == 'sum':
        loss = jnp.sum(loss)
    num_points = pred.shape[-1] // 2
    return loss / num_points * loss_weight


if __name__ == "__main__":
    key = jax.random.PRNGKey(0)
    k1, k2, k3, k4, k5, k6 = jax.random.split(key, 6)

    loss_mod = LinesL1Loss(reduction='mean', loss_weight=1.0, beta=0.5)

    # --- Tiny shape from the module docs: [bs, num_lines, num_points*2] ---
    pred_s = jax.random.normal(k1, (2, 8, 32), dtype=jnp.float32)
    target_s = jax.random.normal(k2, (2, 8, 32), dtype=jnp.float32)
    weight_s = (jax.random.uniform(k3, (2, 8, 32)) > 0.3).astype(jnp.float32)

    out = jax.block_until_ready(loss_mod(pred_s, target_s))
    ref = _reference(pred_s, target_s, None, 0.5, 'mean', 1.0)
    assert jnp.allclose(out, ref, rtol=1e-5, atol=1e-6), (out, ref)

    out_w = jax.block_until_ready(
        loss_mod(pred_s, target_s, weight=weight_s, avg_factor=37.0))
    ref_w = _reference(pred_s, target_s, weight_s, 0.5, 'mean', 1.0, avg_factor=37.0)
    assert jnp.allclose(out_w, ref_w, rtol=1e-5, atol=1e-6), (out_w, ref_w)

    # --- Pallas path (padding-free slab): size = 8*64*128 = 65536 elements ---
    pred = jax.random.normal(k4, (8, 64, 128), dtype=jnp.float32)
    target = jax.random.normal(k5, (8, 64, 128), dtype=jnp.float32)
    weight = (jax.random.uniform(k6, (8, 64, 128)) > 0.3).astype(jnp.float32)

    out = jax.block_until_ready(loss_mod(pred, target))
    ref = _reference(pred, target, None, 0.5, 'mean', 1.0)
    assert jnp.allclose(out, ref, rtol=1e-5, atol=1e-5), (out, ref)

    out_w = jax.block_until_ready(
        loss_mod(pred, target, weight=weight, avg_factor=29000.0))
    ref_w = _reference(pred, target, weight, 0.5, 'mean', 1.0, avg_factor=29000.0)
    assert jnp.allclose(out_w, ref_w, rtol=1e-5, atol=1e-5), (out_w, ref_w)

    out_s = jax.block_until_ready(loss_mod(pred, target, reduction_override='sum'))
    ref_s = _reference(pred, target, None, 0.5, 'sum', 1.0)
    assert jnp.allclose(out_s, ref_s, rtol=1e-5, atol=1e-4), (out_s, ref_s)

    out_n = jax.block_until_ready(loss_mod(pred, target, reduction_override='none'))
    ref_n = _reference(pred, target, None, 0.5, 'none', 1.0)
    assert out_n.shape == pred.shape
    assert jnp.allclose(out_n, ref_n, rtol=1e-5, atol=1e-6)

    # Scalar weight (folded in post-kernel, no extra operand stream)
    out_sw = jax.block_until_ready(loss_mod(pred, target, weight=jnp.float32(0.7)))
    ref_sw = _reference(pred, target, jnp.float32(0.7), 0.5, 'mean', 1.0)
    assert jnp.allclose(out_sw, ref_sw, rtol=1e-5, atol=1e-6), (out_sw, ref_sw)

    # Broadcast (per-line) weight
    w_line = (jax.random.uniform(k3, (8, 64, 1)) > 0.5).astype(jnp.float32)
    out_bw = jax.block_until_ready(loss_mod(pred, target, weight=w_line))
    ref_bw = _reference(pred, target, w_line, 0.5, 'mean', 1.0)
    assert jnp.allclose(out_bw, ref_bw, rtol=1e-5, atol=1e-6), (out_bw, ref_bw)

    # bf16 inputs: DMA'd as bf16, computed in f32 inside the kernel
    out_bf = jax.block_until_ready(
        loss_mod(pred.astype(jnp.bfloat16), target.astype(jnp.bfloat16)))
    ref_bf = _reference(pred.astype(jnp.bfloat16), target.astype(jnp.bfloat16),
                        None, 0.5, 'mean', 1.0)
    assert jnp.allclose(out_bf, ref_bf, rtol=1e-3, atol=1e-4), (out_bf, ref_bf)

    # --- Pallas path with a non-128-aligned size (exercises padded slab) ---
    pred_o = jax.random.normal(k1, (3, 157, 150), dtype=jnp.float32)
    target_o = jax.random.normal(k2, (3, 157, 150), dtype=jnp.float32)

    out_om = jax.block_until_ready(loss_mod(pred_o, target_o))
    ref_om = _reference(pred_o, target_o, None, 0.5, 'mean', 1.0)
    assert jnp.allclose(out_om, ref_om, rtol=1e-5, atol=1e-5), (out_om, ref_om)

    out_on = jax.block_until_ready(
        loss_mod(pred_o, target_o, reduction_override='none'))
    ref_on = _reference(pred_o, target_o, None, 0.5, 'none', 1.0)
    assert out_on.shape == pred_o.shape
    assert jnp.allclose(out_on, ref_on, rtol=1e-5, atol=1e-6)

    print("KERNEL_OK")
</pallas_src>

<mosaic_0001>
module attributes {stable_mosaic.version = 11 : i64} {
  func.func @_sum_kernel(%arg0: i32, %arg1: memref<128x512xf32, #tpu.memory_space<vmem>>, %arg2: memref<128x512xf32, #tpu.memory_space<vmem>>, %arg3: memref<1x8x512xf32, #tpu.memory_space<vmem>>) attributes {dimension_semantics = [#tpu.dimension_semantics<arbitrary>], iteration_bounds = array<i64: 1>, scalar_prefetch = 0 : i64, scratch_operands = 0 : i64, tpu.core_type = #tpu.core_type<tc>, window_params = [{transform_indices = @transform_0, window_bounds = array<i64: 128, 512>}, {transform_indices = @transform_1, window_bounds = array<i64: 128, 512>}, {pipeline_mode = #tpu.pipeline_mode<synchronous>, transform_indices = @transform_2, window_bounds = array<i64: 1, 8, 512>}]} {
    %c0_i32 = arith.constant 0 : i32
    %0 = arith.cmpi eq, %arg0, %c0_i32 : i32
    %1 = arith.extui %0 : i1 to i32
    %c0_i32_0 = arith.constant 0 : i32
    %2 = arith.cmpi ne, %1, %c0_i32_0 : i32
    scf.if %2 {
      %cst_13 = arith.constant 0.000000e+00 : f32
      %21 = vector.broadcast %cst_13 : f32 to vector<1x8x512xf32>
      %c0_14 = arith.constant 0 : index
      %c0_15 = arith.constant 0 : index
      %c0_16 = arith.constant 0 : index
      %22 = vector.load %arg3[%c0_14, %c0_15, %c0_16] : memref<1x8x512xf32, #tpu.memory_space<vmem>>, vector<1x8x512xf32>
      tpu.vector_store %arg3[%c0_14, %c0_15, %c0_16], %21 {strides = array<i32>} : memref<1x8x512xf32, #tpu.memory_space<vmem>>, vector<1x8x512xf32>,
    } else {
    }
    %c0 = arith.constant 0 : index
    %c0_1 = arith.constant 0 : index
    %3 = vector.load %arg1[%c0, %c0_1] : memref<128x512xf32, #tpu.memory_space<vmem>>, vector<128x512xf32>
    %c0_2 = arith.constant 0 : index
    %c0_3 = arith.constant 0 : index
    %4 = vector.load %arg2[%c0_2, %c0_3] : memref<128x512xf32, #tpu.memory_space<vmem>>, vector<128x512xf32>
    %5 = arith.subf %3, %4 : vector<128x512xf32>
    %6 = math.absf %5 : vector<128x512xf32>
    %cst = arith.constant 5.000000e-01 : f32
    %7 = vector.broadcast %cst : f32 to vector<128x512xf32>
    %8 = arith.cmpf olt, %6, %7 : vector<128x512xf32>
    %9 = arith.mulf %6, %6 : vector<128x512xf32>
    %cst_4 = arith.constant 1.000000e+00 : f32
    %10 = vector.broadcast %cst_4 : f32 to vector<128x512xf32>
    %11 = arith.mulf %9, %10 : vector<128x512xf32>
    %cst_5 = arith.constant 2.500000e-01 : f32
    %12 = vector.broadcast %cst_5 : f32 to vector<128x512xf32>
    %13 = arith.subf %6, %12 : vector<128x512xf32>
    %14 = arith.select %8, %11, %13 : vector<128x512xi1>, vector<128x512xf32>
    %15 = vector.shape_cast %14 : vector<128x512xf32> to vector<16x8x512xf32>
    %cst_6 = arith.constant dense<0.000000e+00> : vector<8x512xf32>
    %16 = vector.multi_reduction <add>, %15, %cst_6 [0] : vector<16x8x512xf32> to vector<8x512xf32>
    %c0_7 = arith.constant 0 : index
    %c0_8 = arith.constant 0 : index
    %c0_9 = arith.constant 0 : index
    %17 = vector.load %arg3[%c0_7, %c0_8, %c0_9] : memref<1x8x512xf32, #tpu.memory_space<vmem>>, vector<1x8x512xf32>
    %18 = vector.shape_cast %16 : vector<8x512xf32> to vector<1x8x512xf32>
    %19 = arith.addf %17, %18 : vector<1x8x512xf32>
    %c0_10 = arith.constant 0 : index
    %c0_11 = arith.constant 0 : index
    %c0_12 = arith.constant 0 : index
    %20 = vector.load %arg3[%c0_10, %c0_11, %c0_12] : memref<1x8x512xf32, #tpu.memory_space<vmem>>, vector<1x8x512xf32>
    tpu.vector_store %arg3[%c0_10, %c0_11, %c0_12], %19 {strides = array<i32>} : memref<1x8x512xf32, #tpu.memory_space<vmem>>, vector<1x8x512xf32>,
    return
  }
  func.func @transform_0(%arg0: i32) -> (i32, i32) {
    %c0_i32 = arith.constant 0 : i32
    %c0_i32_0 = arith.constant 0 : i32
    return %arg0, %c0_i32 : i32, i32
  }
  func.func @transform_1(%arg0: i32) -> (i32, i32) {
    %c0_i32 = arith.constant 0 : i32
    %c0_i32_0 = arith.constant 0 : i32
    return %arg0, %c0_i32 : i32, i32
  }
  func.func @transform_2(%arg0: i32) -> (i32, i32, i32) {
    %c0_i32 = arith.constant 0 : i32
    %c0_i32_0 = arith.constant 0 : i32
    %c0_i32_1 = arith.constant 0 : i32
    %c0_i32_2 = arith.constant 0 : i32
    return %c0_i32, %c0_i32_0, %c0_i32_1 : i32, i32, i32
  }
}

</mosaic_0001>

<bundles_post_ra>
// kernel: tpu_custom_call.1
= control target key start
LH: loop header
LB: loop body
LE: loop exit
PB: predicated region body
PF: predicated region fallthrough
CT: control target
= control target key end

     0   :  { %7 = vsyncpa [#allocation3], 0  ;;  %s863_s0 = inlined_call_operand.hbm [shape: f32[128,512], index: 0, kind: input, shape index: {}]   ;;  %s864_s1 = inlined_call_operand.hbm [shape: f32[128,512], index: 1, kind: input, shape index: {}]   ;;  %s865_s2 = inlined_call_operand.hbm [shape: f32[1,8,512], index: 2, kind: output, shape index: {}]  }
   0x1   :  { %8 = vsyncpa [#allocation6], 0 }
   0x2   :  { %9 = vsyncpa [#allocation4], 0  ;;  %s784_s9 = smov [#allocation2]  }
   0x3   :  { %s15_s10 = sshll.u32 %s784_s9, 4  ;;  %s16_s10 = int_to_ptr.vmem [resolvable:$true] %s15_s10 }
   0x4   :  { %s726_s11 = scalar_lea.vmem %s16_s10, 8192  ;;  %p731_p1 = scmp.lt.s32.totalorder %s16_s10, %s16_s10 }
   0x5   :  { %p727_p0 = scmp.ne.s32.totalorder %s16_s10, %s726_s11  ;;  %p732_p2 = scmp.lt.s32.totalorder %s726_s11, %s726_s11 }
   0x7   :  { %p733_p3 = por %p732_p2, %p731_p1 }
   0x9   :  { %p734_p4 = pnand %p733_p3, %p727_p0 }
   0xb   :  { %737 = shalt.err (!%p734_p4)
}
   0xc   :  { %s785_s12 = smov 512   ;;  %s786_s13 = smov 32  }
   0xd   :  { %21 = dma.hbm_to_vmem [thread:$0]  %s863_s0, 8192, %s16_s10, [#allocation3], %s785_s12, %s785_s12, %s786_s13  }
   0xe   :  { %s787_s16 = smov [#allocation5]  }
   0xf   :  { %s27_s17 = sshll.u32 %s787_s16, 4  ;;  %s28_s17 = int_to_ptr.vmem [resolvable:$true] %s27_s17 }
  0x10   :  { %s746_s18 = scalar_lea.vmem %s28_s17, 8192  ;;  %p751_p6 = scmp.lt.s32.totalorder %s28_s17, %s28_s17 }
  0x11   :  { %p747_p5 = scmp.ne.s32.totalorder %s28_s17, %s746_s18  ;;  %p752_p7 = scmp.lt.s32.totalorder %s746_s18, %s746_s18 }
  0x13   :  { %p753_p8 = por %p752_p7, %p751_p6 }
  0x15   :  { %p754_p9 = pnand %p753_p8, %p747_p5 }
  0x17   :  { %757 = shalt.err (!%p754_p9)
}
  0x18   :  { %33 = dma.hbm_to_vmem [thread:$0]  %s864_s1, 8192, %s28_s17, [#allocation6], %s785_s12, %s785_s12, %s786_s13  }
  0x19   :  { %778 = dma.done.wait [#allocation3], 8192  }
  0x1a   :  { %779 = vsyncadd [#allocation3], 4294959104 }
  0x1b   :  { %780 = dma.done.wait [#allocation6], 8192  }
  0x1c   :  { %781 = vsyncadd [#allocation6], 4294959104  ;;  %v48_v0 = vld [vmem:[#allocation2] sm:$0xff]  ;;  %s788_s0 = smov [#allocation7]  }
  0x1d   :  { %v52_v1 = vld [vmem:[#allocation2 + $0x20] sm:$0xff]  ;;  %s638_s1 = sshll.u32 %s788_s0, 4  ;;  %s639_s1 = int_to_ptr.vmem [resolvable:$true] %s638_s1 }
  0x1e   :  { %v112_v2 = vld [vmem:[#allocation5] sm:$0xff]  ;;  %s758_s21 = scalar_lea.vmem %s639_s1, 512  ;;  %p763_p11 = scmp.lt.s32.totalorder %s639_s1, %s639_s1 }
  0x1f   :  { %v116_v3 = vld [vmem:[#allocation5 + $0x20] sm:$0xff]  ;;  %v176_v8 = vsub.f32 %v48_v0, %v112_v2  ;;  %p759_p10 = scmp.ne.s32.totalorder %s639_s1, %s758_s21  ;;  %p764_p12 = scmp.lt.s32.totalorder %s758_s21, %s758_s21 }
  0x20   :  { %v56_v4 = vld [vmem:[#allocation2 + $0x40] sm:$0xff]  ;;  %v180_v9 = vsub.f32 %v52_v1, %v116_v3 }
  0x21   :  { %v120_v5 = vld [vmem:[#allocation5 + $0x40] sm:$0xff]  ;;  %v240_v16 = vand.u32 2147483647, %v176_v8  ;;  %p765_p13 = por %p764_p12, %p763_p11 }
  0x22   :  { %v60_v6 = vld [vmem:[#allocation2 + $0x60] sm:$0xff]  ;;  %v184_v10 = vsub.f32 %v56_v4, %v120_v5  ;;  %v244_v17 = vand.u32 2147483647, %v180_v9 }
  0x23   :  { %v124_v7 = vld [vmem:[#allocation5 + $0x60] sm:$0xff]  ;;  %v368_v26 = vmul.f32 %v240_v16, %v240_v16  ;;  %v648_v28 = vadd.f32 -0.25, %v240_v16  ;;  %vm304_vm0 = vcmp.lt.f32.partialorder %v240_v16, 0.5  ;;  %p766_p0 = pnand %p765_p13, %p759_p10 }
  0x24   :  { %v64_v11 = vld [vmem:[#allocation2 + $0x80] sm:$0xff]  ;;  %v188_v13 = vsub.f32 %v60_v6, %v124_v7  ;;  %v248_v19 = vand.u32 2147483647, %v184_v10  ;;  %v372_v27 = vmul.f32 %v244_v17, %v244_v17  ;;  %v652_v29 = vadd.f32 -0.25, %v244_v17 }
  0x25   :  { %v128_v12 = vld [vmem:[#allocation5 + $0x80] sm:$0xff]  ;;  %vm308_vm1 = vcmp.lt.f32.partialorder %v244_v17, 0.5  ;;  %v496_v44 = vsel %vm304_vm0, %v368_v26, %v648_v28 }
  0x26   :  { %v68_v14 = vld [vmem:[#allocation2 + $0xa0] sm:$0xff]  ;;  %v192_v18 = vsub.f32 %v64_v11, %v128_v12  ;;  %v252_v23 = vand.u32 2147483647, %v188_v13  ;;  %v376_v34 = vmul.f32 %v248_v19, %v248_v19  ;;  %v656_v35 = vadd.f32 -0.25, %v248_v19 }
  0x27   :  { %v132_v15 = vld [vmem:[#allocation5 + $0xa0] sm:$0xff]  ;;  %vm312_vm2 = vcmp.lt.f32.partialorder %v248_v19, 0.5  ;;  %v500_v45 = vsel %vm308_vm1, %v372_v27, %v652_v29 }
  0x28   :  { %v72_v20 = vld [vmem:[#allocation2 + $0xc0] sm:$0xff]  ;;  %v196_v22 = vsub.f32 %v68_v14, %v132_v15  ;;  %v256_v33 = vand.u32 2147483647, %v192_v18  ;;  %v380_v42 = vmul.f32 %v252_v23, %v252_v23  ;;  %v660_v43 = vadd.f32 -0.25, %v252_v23 }
  0x29   :  { %v136_v21 = vld [vmem:[#allocation5 + $0xc0] sm:$0xff]  ;;  %vm316_vm3 = vcmp.lt.f32.partialorder %v252_v23, 0.5  ;;  %v504_v54 = vsel %vm312_vm2, %v376_v34, %v656_v35  ;;  %v560_v58 = vadd.f32 %v500_v45, %v496_v44  ;;  %v53_v35 = vld [vmem:[#allocation2 + $0x28] sm:$0xff] }
  0x2a   :  { %v76_v24 = vld [vmem:[#allocation2 + $0xe0] sm:$0xff]  ;;  %v200_v32 = vsub.f32 %v72_v20, %v136_v21  ;;  %v260_v38 = vand.u32 2147483647, %v196_v22  ;;  %v384_v52 = vmul.f32 %v256_v33, %v256_v33  ;;  %v664_v53 = vadd.f32 -0.25, %v256_v33  ;;  %v121_v44 = vld [vmem:[#allocation5 + $0x48] sm:$0xff] }
  0x2b   :  { %v140_v25 = vld [vmem:[#allocation5 + $0xe0] sm:$0xff]  ;;  %vm320_vm4 = vcmp.lt.f32.partialorder %v256_v33, 0.5  ;;  %v508_v1 = vsel %vm316_vm3, %v380_v42, %v660_v43  ;;  %v561_v4 = vadd.f32 %v560_v58, %v504_v54  ;;  %v57_v43 = vld [vmem:[#allocation2 + $0x48] sm:$0xff] }
  0x2c   :  { %v80_v30 = vld [vmem:[#allocation2 + $0x100] sm:$0xff]  ;;  %v204_v37 = vsub.f32 %v76_v24, %v140_v25  ;;  %v264_v51 = vand.u32 2147483647, %v200_v32  ;;  %v388_v63 = vmul.f32 %v260_v38, %v260_v38  ;;  %v668_v0 = vadd.f32 -0.25, %v260_v38  ;;  %v49_v32 = vld [vmem:[#allocation2 + $0x8] sm:$0xff] }
  0x2d   :  { %v144_v31 = vld [vmem:[#allocation5 + $0x100] sm:$0xff]  ;;  %vm324_vm5 = vcmp.lt.f32.partialorder %v260_v38, 0.5  ;;  %v512_v10 = vsel %vm320_vm4, %v384_v52, %v664_v53  ;;  %v562_v13 = vadd.f32 %v561_v4, %v508_v1 }
  0x2e   :  { %v84_v36 = vld [vmem:[#allocation2 + $0x120] sm:$0xff]  ;;  %v208_v47 = vsub.f32 %v80_v30, %v144_v31  ;;  %v268_v62 = vand.u32 2147483647, %v204_v37  ;;  %v392_v8 = vmul.f32 %v264_v51, %v264_v51  ;;  %v672_v9 = vadd.f32 -0.25, %v264_v51  ;;  %v117_v37 = vld [vmem:[#allocation5 + $0x28] sm:$0xff] }
  0x2f   :  { %v88_v39 = vld [vmem:[#allocation2 + $0x140] sm:$0xff]  ;;  %vm328_vm6 = vcmp.lt.f32.partialorder %v264_v51, 0.5  ;;  %v516_v17 = vsel %vm324_vm5, %v388_v63, %v668_v0  ;;  %v563_v20 = vadd.f32 %v562_v13, %v512_v10  ;;  %v129_v63 = vld [vmem:[#allocation5 + $0x88] sm:$0xff] }
  0x30   :  { %v148_v40 = vld [vmem:[#allocation5 + $0x120] sm:$0xff]  ;;  %v272_v7 = vand.u32 2147483647, %v208_v47  ;;  %v396_v15 = vmul.f32 %v268_v62, %v268_v62  ;;  %v676_v16 = vadd.f32 -0.25, %v268_v62  ;;  %vm332_vm7 = vcmp.lt.f32.partialorder %v268_v62, 0.5  ;;  %v61_v47 = vld [vmem:[#allocation2 + $0x68] sm:$0xff] }
  0x31   :  { %v152_v41 = vld [vmem:[#allocation5 + $0x140] sm:$0xff]  ;;  %v212_v56 = vsub.f32 %v84_v36, %v148_v40  ;;  %v520_v24 = vsel %vm328_vm6, %v392_v8, %v672_v9  ;;  %v564_v27 = vadd.f32 %v563_v20, %v516_v17  ;;  %v113_v36 = vld [vmem:[#allocation5 + $0x8] sm:$0xff] }
  0x32   :  { %v92_v46 = vld [vmem:[#allocation2 + $0x160] sm:$0xff]  ;;  %v216_v57 = vsub.f32 %v88_v39, %v152_v41  ;;  %v400_v22 = vmul.f32 %v272_v7, %v272_v7  ;;  %v680_v23 = vadd.f32 -0.25, %v272_v7  ;;  %vm336_vm8 = vcmp.lt.f32.partialorder %v272_v7, 0.5  ;;  %v69_v62 = vld [vmem:[#allocation2 + $0xa8] sm:$0xff] }
  0x33   :  { %v96_v48 = vld [vmem:[#allocation2 + $0x180] sm:$0xff]  ;;  %v276_v14 = vand.u32 2147483647, %v212_v56  ;;  %v524_v31 = vsel %vm332_vm7, %v396_v15, %v676_v16  ;;  %v565_v34 = vadd.f32 %v564_v27, %v520_v24  ;;  %v137_v15 = vld [vmem:[#allocation5 + $0xc8] sm:$0xff] }
  0x34   :  { %v156_v49 = vld [vmem:[#allocation5 + $0x160] sm:$0xff]  ;;  %v280_v19 = vand.u32 2147483647, %v216_v57  ;;  %v528_v40 = vsel %vm336_vm8, %v400_v22, %v680_v23  ;;  %v185_v57 = vsub.f32 %v57_v43, %v121_v44  ;;  %v85_v27 = vld [vmem:[#allocation2 + $0x128] sm:$0xff] }
  0x35   :  { %v160_v50 = vld [vmem:[#allocation5 + $0x180] sm:$0xff]  ;;  %v220_v2 = vsub.f32 %v92_v46, %v156_v49  ;;  %v404_v29 = vmul.f32 %v276_v14, %v276_v14  ;;  %v684_v30 = vadd.f32 -0.25, %v276_v14  ;;  %vm340_vm9 = vcmp.lt.f32.partialorder %v276_v14, 0.5  ;;  %v73_v14 = vld [vmem:[#allocation2 + $0xc8] sm:$0xff] }
  0x36   :  { %v100_v55 = vld [vmem:[#allocation2 + $0x1a0] sm:$0xff]  ;;  %v224_v3 = vsub.f32 %v96_v48, %v160_v50  ;;  %vm344_vm10 = vcmp.lt.f32.partialorder %v280_v19, 0.5  ;;  %v408_v38 = vmul.f32 %v280_v19, %v280_v19  ;;  %v688_v39 = vadd.f32 -0.25, %v280_v19  ;;  %v125_v48 = vld [vmem:[#allocation5 + $0x68] sm:$0xff] }
  0x37   :  { %v104_v59 = vld [vmem:[#allocation2 + $0x1c0] sm:$0xff]  ;;  %v284_v21 = vand.u32 2147483647, %v220_v2  ;;  %v566_v42 = vadd.f32 %v565_v34, %v524_v31  ;;  %v532_v46 = vsel %vm340_vm9, %v404_v29, %v684_v30  ;;  %v177_v49 = vsub.f32 %v49_v32, %v113_v36  ;;  %v133_v2 = vld [vmem:[#allocation5 + $0xa8] sm:$0xff] }
  0x38   :  { %v164_v60 = vld [vmem:[#allocation5 + $0x1a0] sm:$0xff]  ;;  %v288_v25 = vand.u32 2147483647, %v224_v3  ;;  %v181_v50 = vsub.f32 %v53_v35, %v117_v37  ;;  %v536_v56 = vsel %vm344_vm10, %v408_v38, %v688_v39  ;;  %v189_v0 = vsub.f32 %v61_v47, %v125_v48  ;;  %v141_v19 = vld [vmem:[#allocation5 + $0xe8] sm:$0xff] }
  0x39   :  { %v168_v61 = vld [vmem:[#allocation5 + $0x1c0] sm:$0xff]  ;;  %v228_v11 = vsub.f32 %v100_v55, %v164_v60  ;;  %vm348_vm11 = vcmp.lt.f32.partialorder %v284_v21, 0.5  ;;  %v412_v41 = vmul.f32 %v284_v21, %v284_v21  ;;  %v692_v45 = vadd.f32 -0.25, %v284_v21  ;;  %v149_v29 = vld [vmem:[#allocation5 + $0x128] sm:$0xff] }
  0x3a   :  { %v108_v5 = vld [vmem:[#allocation2 + $0x1e0] sm:$0xff]  ;;  %v232_v12 = vsub.f32 %v104_v59, %v168_v61  ;;  %vm352_vm12 = vcmp.lt.f32.partialorder %v288_v25, 0.5  ;;  %v416_v51 = vmul.f32 %v288_v25, %v288_v25  ;;  %v567_v53 = vadd.f32 %v566_v42, %v528_v40  ;;  %v65_v61 = vld [vmem:[#allocation2 + $0x88] sm:$0xff] }
  0x3b   :  { %v172_v6 = vld [vmem:[#allocation5 + $0x1e0] sm:$0xff]  ;;  %v292_v26 = vand.u32 2147483647, %v228_v11  ;;  %v696_v54 = vadd.f32 -0.25, %v288_v25  ;;  %v540_v1 = vsel %vm348_vm11, %v412_v41, %v692_v45  ;;  %v241_v3 = vand.u32 2147483647, %v177_v49 }
  0x3c   :  { %v236_v18 = vsub.f32 %v108_v5, %v172_v6  ;;  %v296_v28 = vand.u32 2147483647, %v232_v12  ;;  %v568_v60 = vadd.f32 %v567_v53, %v532_v46  ;;  %v245_v4 = vand.u32 2147483647, %v181_v50  ;;  %v89_v38 = vld [vmem:[#allocation2 + $0x148] sm:$0xff] }
  0x3d   :  { %vm356_vm13 = vcmp.lt.f32.partialorder %v292_v26, 0.5  ;;  %v420_v52 = vmul.f32 %v292_v26, %v292_v26  ;;  %v700_v55 = vadd.f32 -0.25, %v292_v26  ;;  %v544_v8 = vsel %vm352_vm12, %v416_v51, %v696_v54  ;;  %v81_v26 = vld [vmem:[#allocation2 + $0x108] sm:$0xff] }
  0x3e   :  { %v815_v33 = vand.u32 2147483647, %v236_v18  ;;  %v424_v58 = vmul.f32 %v296_v28, %v296_v28  ;;  %v704_v59 = vadd.f32 -0.25, %v296_v28  ;;  %vm360_vm14 = vcmp.lt.f32.partialorder %v296_v28, 0.5  ;;  %v77_v18 = vld [vmem:[#allocation2 + $0xe8] sm:$0xff] }
  0x3f   :  { %v569_v7 = vadd.f32 %v568_v60, %v536_v56  ;;  %v548_v9 = vsel %vm356_vm13, %v420_v52, %v700_v55  ;;  %v193_v10 = vsub.f32 %v65_v61, %v129_v63  ;;  %v249_v11 = vand.u32 2147483647, %v185_v57  ;;  %v145_v28 = vld [vmem:[#allocation5 + $0x108] sm:$0xff] }
  0x40   :  { %vm364_vm15 = vcmp.lt.f32.partialorder %v815_v33, 0.5  ;;  %v428_v5 = vmul.f32 %v815_v33, %v815_v33  ;;  %v708_v6 = vadd.f32 -0.25, %v815_v33  ;;  %v552_v12 = vsel %vm360_vm14, %v424_v58, %v704_v59  ;;  %v153_v39 = vld [vmem:[#allocation5 + $0x148] sm:$0xff] }
  0x41   :  { %v570_v13 = vadd.f32 %v569_v7, %v540_v1  ;;  %v197_v16 = vsub.f32 %v69_v62, %v133_v2  ;;  %v253_v17 = vand.u32 2147483647, %v189_v0  ;;  %v369_v20 = vmul.f32 %v241_v3, %v241_v3  ;;  %v93_v46 = vld [vmem:[#allocation2 + $0x168] sm:$0xff] }
  0x42   :  { %v373_v21 = vmul.f32 %v245_v4, %v245_v4  ;;  %v649_v22 = vadd.f32 -0.25, %v241_v3  ;;  %v653_v23 = vadd.f32 -0.25, %v245_v4  ;;  %v556_v24 = vsel %vm364_vm15, %v428_v5, %v708_v6  ;;  %v157_v47 = vld [vmem:[#allocation5 + $0x168] sm:$0xff] }
  0x43   :  { %v571_v25 = vadd.f32 %v570_v13, %v544_v8  ;;  %vm305_vm0 = vcmp.lt.f32.partialorder %v241_v3, 0.5  ;;  %vm309_vm1 = vcmp.lt.f32.partialorder %v245_v4, 0.5  ;;  %v201_v30 = vsub.f32 %v73_v14, %v137_v15  ;;  %v97_v53 = vld [vmem:[#allocation2 + $0x188] sm:$0xff] }
  0x44   :  { %v257_v31 = vand.u32 2147483647, %v193_v10  ;;  %v377_v32 = vmul.f32 %v249_v11, %v249_v11  ;;  %v657_v34 = vadd.f32 -0.25, %v249_v11  ;;  %v205_v36 = vsub.f32 %v77_v18, %v141_v19  ;;  %v101_v56 = vld [vmem:[#allocation2 + $0x1a8] sm:$0xff] }
  0x45   :  { %v572_v35 = vadd.f32 %v571_v25, %v548_v9  ;;  %v261_v37 = vand.u32 2147483647, %v197_v16  ;;  %vm313_vm2 = vcmp.lt.f32.partialorder %v249_v11, 0.5  ;;  %v381_v40 = vmul.f32 %v253_v17, %v253_v17  ;;  %v161_v57 = vld [vmem:[#allocation5 + $0x188] sm:$0xff] }
  0x46   :  { %v661_v33 = vadd.f32 -0.25, %v253_v17  ;;  %v497_v41 = vsel %vm305_vm0, %v369_v20, %v649_v22  ;;  %v501_v42 = vsel %vm309_vm1, %v373_v21, %v653_v23  ;;  %v209_v44 = vsub.f32 %v81_v26, %v145_v28  ;;  %v165_v58 = vld [vmem:[#allocation5 + $0x1a8] sm:$0xff] }
  0x47   :  { %v573_v43 = vadd.f32 %v572_v35, %v552_v12  ;;  %v213_v45 = vsub.f32 %v85_v27, %v149_v29  ;;  %vm317_vm3 = vcmp.lt.f32.partialorder %v253_v17, 0.5  ;;  %v265_v48 = vand.u32 2147483647, %v201_v30  ;;  %v105_v63 = vld [vmem:[#allocation2 + $0x1c8] sm:$0xff]  ;;  %v50_v30 = vld [vmem:[#allocation2 + $0x10] sm:$0xff] }
  0x48   :  { %v385_v49 = vmul.f32 %v257_v31, %v257_v31  ;;  %v665_v50 = vadd.f32 -0.25, %v257_v31  ;;  %v505_v51 = vsel %vm313_vm2, %v377_v32, %v657_v34  ;;  %v217_v54 = vsub.f32 %v89_v38, %v153_v39  ;;  %v109_v2 = vld [vmem:[#allocation2 + $0x1e8] sm:$0xff]  ;;  %v114_v32 = vld [vmem:[#allocation5 + $0x10] sm:$0xff] }
  0x49   :  { %v574_v52 = vadd.f32 %v573_v43, %v556_v24  ;;  %vm321_vm4 = vcmp.lt.f32.partialorder %v257_v31, 0.5  ;;  %v575_v55 = vadd.f32 %v501_v42, %v497_v41  ;;  %v269_v59 = vand.u32 2147483647, %v205_v36  ;;  %v169_v3 = vld [vmem:[#allocation5 + $0x1c8] sm:$0xff]  ;;  %v54_v31 = vld [vmem:[#allocation2 + $0x30] sm:$0xff] }
  0x4a   :  { %v389_v60 = vmul.f32 %v261_v37, %v261_v37  ;;  %v669_v61 = vadd.f32 -0.25, %v261_v37  ;;  %v509_v62 = vsel %vm317_vm3, %v381_v40, %v661_v33  ;;  %v221_v0 = vsub.f32 %v93_v46, %v157_v47  ;;  %v173_v4 = vld [vmem:[#allocation5 + $0x1e8] sm:$0xff]  ;;  %v58_v42 = vld [vmem:[#allocation2 + $0x50] sm:$0xff] }
  0x4b   :  { %vm325_vm5 = vcmp.lt.f32.partialorder %v261_v37, 0.5  ;;  %v576_v1 = vadd.f32 %v575_v55, %v505_v51  ;;  %v273_v5 = vand.u32 2147483647, %v209_v44  ;;  %v393_v6 = vmul.f32 %v265_v48, %v265_v48  ;;  %628 = vst [vmem:[#allocation7] sm:$0xff] %v574_v52  ;;  %v118_v37 = vld [vmem:[#allocation5 + $0x30] sm:$0xff] }
  0x4c   :  { %v673_v7 = vadd.f32 -0.25, %v265_v48  ;;  %v513_v8 = vsel %vm321_vm4, %v385_v49, %v665_v50  ;;  %v225_v9 = vsub.f32 %v97_v53, %v161_v57  ;;  %v229_v10 = vsub.f32 %v101_v56, %v165_v58  ;;  %v122_v43 = vld [vmem:[#allocation5 + $0x50] sm:$0xff] }
  0x4d   :  { %vm329_vm6 = vcmp.lt.f32.partialorder %v265_v48, 0.5  ;;  %v577_v11 = vadd.f32 %v576_v1, %v509_v62  ;;  %v277_v12 = vand.u32 2147483647, %v213_v45  ;;  %v397_v13 = vmul.f32 %v269_v59, %v269_v59  ;;  %v62_v46 = vld [vmem:[#allocation2 + $0x70] sm:$0xff] }
  0x4e   :  { %v677_v14 = vadd.f32 -0.25, %v269_v59  ;;  %v517_v15 = vsel %vm325_vm5, %v389_v60, %v669_v61  ;;  %v233_v16 = vsub.f32 %v105_v63, %v169_v3  ;;  %v237_v17 = vsub.f32 %v109_v2, %v173_v4  ;;  %v126_v47 = vld [vmem:[#allocation5 + $0x70] sm:$0xff] }
  0x4f   :  { %vm333_vm7 = vcmp.lt.f32.partialorder %v269_v59, 0.5  ;;  %v578_v18 = vadd.f32 %v577_v11, %v513_v8  ;;  %v281_v19 = vand.u32 2147483647, %v217_v54  ;;  %v401_v20 = vmul.f32 %v273_v5, %v273_v5  ;;  %v66_v60 = vld [vmem:[#allocation2 + $0x90] sm:$0xff] }
  0x50   :  { %v681_v21 = vadd.f32 -0.25, %v273_v5  ;;  %v521_v22 = vsel %vm329_vm6, %v393_v6, %v673_v7  ;;  %v285_v23 = vand.u32 2147483647, %v221_v0  ;;  %v289_v24 = vand.u32 2147483647, %v225_v9  ;;  %v70_v61 = vld [vmem:[#allocation2 + $0xb0] sm:$0xff] }
  0x51   :  { %vm337_vm8 = vcmp.lt.f32.partialorder %v273_v5, 0.5  ;;  %v579_v25 = vadd.f32 %v578_v18, %v517_v15  ;;  %v293_v26 = vand.u32 2147483647, %v229_v10  ;;  %v405_v27 = vmul.f32 %v277_v12, %v277_v12  ;;  %v130_v62 = vld [vmem:[#allocation5 + $0x90] sm:$0xff] }
  0x52   :  { %v685_v28 = vadd.f32 -0.25, %v277_v12  ;;  %v525_v29 = vsel %vm333_vm7, %v397_v13, %v677_v14  ;;  %v297_v34 = vand.u32 2147483647, %v233_v16  ;;  %v301_v35 = vand.u32 2147483647, %v237_v17  ;;  %v134_v1 = vld [vmem:[#allocation5 + $0xb0] sm:$0xff] }
  0x53   :  { %vm341_vm9 = vcmp.lt.f32.partialorder %v277_v12, 0.5  ;;  %v580_v36 = vadd.f32 %v579_v25, %v521_v22  ;;  %vm345_vm10 = vcmp.lt.f32.partialorder %v281_v19, 0.5  ;;  %v409_v38 = vmul.f32 %v281_v19, %v281_v19  ;;  %v74_v13 = vld [vmem:[#allocation2 + $0xd0] sm:$0xff] }
  0x54   :  { %v689_v39 = vadd.f32 -0.25, %v281_v19  ;;  %v529_v40 = vsel %vm337_vm8, %v401_v20, %v681_v21  ;;  %vm349_vm11 = vcmp.lt.f32.partialorder %v285_v23, 0.5  ;;  %vm353_vm12 = vcmp.lt.f32.partialorder %v289_v24, 0.5  ;;  %v138_v14 = vld [vmem:[#allocation5 + $0xd0] sm:$0xff] }
  0x55   :  { %v413_v33 = vmul.f32 %v285_v23, %v285_v23  ;;  %v581_v41 = vadd.f32 %v580_v36, %v525_v29  ;;  %v693_v44 = vadd.f32 -0.25, %v285_v23  ;;  %v533_v45 = vsel %vm341_vm9, %v405_v27, %v685_v28  ;;  %v78_v17 = vld [vmem:[#allocation2 + $0xf0] sm:$0xff] }
  0x56   :  { %v178_v48 = vsub.f32 %v50_v30, %v114_v32  ;;  %v182_v49 = vsub.f32 %v54_v31, %v118_v37  ;;  %vm357_vm13 = vcmp.lt.f32.partialorder %v293_v26, 0.5  ;;  %v417_v50 = vmul.f32 %v289_v24, %v289_v24  ;;  %v142_v18 = vld [vmem:[#allocation5 + $0xf0] sm:$0xff] }
  0x57   :  { %v421_v51 = vmul.f32 %v293_v26, %v293_v26  ;;  %v582_v52 = vadd.f32 %v581_v41, %v529_v40  ;;  %v697_v53 = vadd.f32 -0.25, %v289_v24  ;;  %v701_v54 = vadd.f32 -0.25, %v293_v26  ;;  %v82_v25 = vld [vmem:[#allocation2 + $0x110] sm:$0xff] }
  0x58   :  { %v537_v55 = vsel %vm345_vm10, %v409_v38, %v689_v39  ;;  %v186_v56 = vsub.f32 %v58_v42, %v122_v43  ;;  %v425_v57 = vmul.f32 %v297_v34, %v297_v34  ;;  %v705_v58 = vadd.f32 -0.25, %v297_v34  ;;  %v86_v26 = vld [vmem:[#allocation2 + $0x130] sm:$0xff] }
  0x59   :  { %v583_v59 = vadd.f32 %v582_v52, %v533_v45  ;;  %v190_v63 = vsub.f32 %v62_v46, %v126_v47  ;;  %vm361_vm14 = vcmp.lt.f32.partialorder %v297_v34, 0.5  ;;  %v541_v0 = vsel %vm349_vm11, %v413_v33, %v693_v44  ;;  %v146_v27 = vld [vmem:[#allocation5 + $0x110] sm:$0xff] }
  0x5a   :  { %v242_v2 = vand.u32 2147483647, %v178_v48  ;;  %v246_v3 = vand.u32 2147483647, %v182_v49  ;;  %vm365_vm15 = vcmp.lt.f32.partialorder %v301_v35, 0.5  ;;  %v429_v4 = vmul.f32 %v301_v35, %v301_v35  ;;  %v150_v28 = vld [vmem:[#allocation5 + $0x130] sm:$0xff] }
  0x5b   :  { %v709_v5 = vadd.f32 -0.25, %v301_v35  ;;  %v584_v6 = vadd.f32 %v583_v59, %v537_v55  ;;  %v545_v7 = vsel %vm353_vm12, %v417_v50, %v697_v53  ;;  %v549_v8 = vsel %vm357_vm13, %v421_v51, %v701_v54  ;;  %v90_v38 = vld [vmem:[#allocation2 + $0x150] sm:$0xff] }
  0x5c   :  { %v194_v9 = vsub.f32 %v66_v60, %v130_v62  ;;  %v250_v10 = vand.u32 2147483647, %v186_v56  ;;  %v553_v11 = vsel %vm361_vm14, %v425_v57, %v705_v58  ;;  %v198_v15 = vsub.f32 %v70_v61, %v134_v1  ;;  %v154_v39 = vld [vmem:[#allocation5 + $0x150] sm:$0xff] }
  0x5d   :  { %v585_v12 = vadd.f32 %v584_v6, %v541_v0  ;;  %v254_v16 = vand.u32 2147483647, %v190_v63  ;;  %v370_v19 = vmul.f32 %v242_v2, %v242_v2  ;;  %v374_v20 = vmul.f32 %v246_v3, %v246_v3  ;;  %v94_v45 = vld [vmem:[#allocation2 + $0x170] sm:$0xff] }
  0x5e   :  { %v650_v21 = vadd.f32 -0.25, %v242_v2  ;;  %v654_v22 = vadd.f32 -0.25, %v246_v3  ;;  %v557_v23 = vsel %vm365_vm15, %v429_v4, %v709_v5  ;;  %vm306_vm0 = vcmp.lt.f32.partialorder %v242_v2, 0.5  ;;  %v158_v46 = vld [vmem:[#allocation5 + $0x170] sm:$0xff] }
  0x5f   :  { %v586_v24 = vadd.f32 %v585_v12, %v545_v7  ;;  %vm310_vm1 = vcmp.lt.f32.partialorder %v246_v3, 0.5  ;;  %v202_v29 = vsub.f32 %v74_v13, %v138_v14  ;;  %v258_v30 = vand.u32 2147483647, %v194_v9  ;;  %v98_v52 = vld [vmem:[#allocation2 + $0x190] sm:$0xff] }
  0x60   :  { %v378_v31 = vmul.f32 %v250_v10, %v250_v10  ;;  %v658_v32 = vadd.f32 -0.25, %v250_v10  ;;  %v206_v36 = vsub.f32 %v78_v17, %v142_v18  ;;  %v262_v37 = vand.u32 2147483647, %v198_v15  ;;  %v102_v55 = vld [vmem:[#allocation2 + $0x1b0] sm:$0xff] }
  0x61   :  { %v587_v34 = vadd.f32 %v586_v24, %v549_v8  ;;  %vm314_vm2 = vcmp.lt.f32.partialorder %v250_v10, 0.5  ;;  %v382_v40 = vmul.f32 %v254_v16, %v254_v16  ;;  %v662_v35 = vadd.f32 -0.25, %v254_v16  ;;  %v162_v56 = vld [vmem:[#allocation5 + $0x190] sm:$0xff] }
  0x62   :  { %v498_v33 = vsel %vm306_vm0, %v370_v19, %v650_v21  ;;  %v502_v41 = vsel %vm310_vm1, %v374_v20, %v654_v22  ;;  %v210_v43 = vsub.f32 %v82_v25, %v146_v27  ;;  %v214_v44 = vsub.f32 %v86_v26, %v150_v28  ;;  %v166_v57 = vld [vmem:[#allocation5 + $0x1b0] sm:$0xff] }
  0x63   :  { %v588_v42 = vadd.f32 %v587_v34, %v553_v11  ;;  %vm318_vm3 = vcmp.lt.f32.partialorder %v254_v16, 0.5  ;;  %v266_v47 = vand.u32 2147483647, %v202_v29  ;;  %v386_v48 = vmul.f32 %v258_v30, %v258_v30  ;;  %v106_v62 = vld [vmem:[#allocation2 + $0x1d0] sm:$0xff]  ;;  %v51_v29 = vld [vmem:[#allocation2 + $0x18] sm:$0xff] }
  0x64   :  { %v666_v49 = vadd.f32 -0.25, %v258_v30  ;;  %v506_v50 = vsel %vm314_vm2, %v378_v31, %v658_v32  ;;  %v218_v53 = vsub.f32 %v90_v38, %v154_v39  ;;  %vm322_vm4 = vcmp.lt.f32.partialorder %v258_v30, 0.5  ;;  %v110_v1 = vld [vmem:[#allocation2 + $0x1f0] sm:$0xff]  ;;  %v55_v30 = vld [vmem:[#allocation2 + $0x38] sm:$0xff] }
  0x65   :  { %v589_v51 = vadd.f32 %v588_v42, %v557_v23  ;;  %v590_v54 = vadd.f32 %v502_v41, %v498_v33  ;;  %v270_v58 = vand.u32 2147483647, %v206_v36  ;;  %v390_v59 = vmul.f32 %v262_v37, %v262_v37  ;;  %v170_v2 = vld [vmem:[#allocation5 + $0x1d0] sm:$0xff]  ;;  %v115_v31 = vld [vmem:[#allocation5 + $0x18] sm:$0xff] }
  0x66   :  { %v670_v60 = vadd.f32 -0.25, %v262_v37  ;;  %v510_v61 = vsel %vm318_vm3, %v382_v40, %v662_v35  ;;  %v222_v63 = vsub.f32 %v94_v45, %v158_v46  ;;  %vm326_vm5 = vcmp.lt.f32.partialorder %v262_v37, 0.5  ;;  %v174_v3 = vld [vmem:[#allocation5 + $0x1f0] sm:$0xff]  ;;  %v119_v37 = vld [vmem:[#allocation5 + $0x38] sm:$0xff] }
  0x67   :  { %v591_v0 = vadd.f32 %v590_v54, %v506_v50  ;;  %v274_v4 = vand.u32 2147483647, %v210_v43  ;;  %v394_v5 = vmul.f32 %v266_v47, %v266_v47  ;;  %v674_v6 = vadd.f32 -0.25, %v266_v47  ;;  %629 = vst [vmem:[#allocation7 + $0x8] sm:$0xff] %v589_v51  ;;  %v59_v41 = vld [vmem:[#allocation2 + $0x58] sm:$0xff] }
  0x68   :  { %v514_v7 = vsel %vm322_vm4, %v386_v48, %v666_v49  ;;  %v226_v8 = vsub.f32 %v98_v52, %v162_v56  ;;  %v230_v9 = vsub.f32 %v102_v55, %v166_v57  ;;  %vm330_vm6 = vcmp.lt.f32.partialorder %v266_v47, 0.5  ;;  %v123_v42 = vld [vmem:[#allocation5 + $0x58] sm:$0xff] }
  0x69   :  { %v592_v10 = vadd.f32 %v591_v0, %v510_v61  ;;  %v278_v11 = vand.u32 2147483647, %v214_v44  ;;  %v398_v12 = vmul.f32 %v270_v58, %v270_v58  ;;  %v678_v13 = vadd.f32 -0.25, %v270_v58  ;;  %v63_v45 = vld [vmem:[#allocation2 + $0x78] sm:$0xff] }
  0x6a   :  { %v518_v14 = vsel %vm326_vm5, %v390_v59, %v670_v60  ;;  %v234_v15 = vsub.f32 %v106_v62, %v170_v2  ;;  %v238_v16 = vsub.f32 %v110_v1, %v174_v3  ;;  %vm334_vm7 = vcmp.lt.f32.partialorder %v270_v58, 0.5  ;;  %v127_v46 = vld [vmem:[#allocation5 + $0x78] sm:$0xff] }
  0x6b   :  { %v593_v17 = vadd.f32 %v592_v10, %v514_v7  ;;  %v282_v18 = vand.u32 2147483647, %v218_v53  ;;  %v402_v19 = vmul.f32 %v274_v4, %v274_v4  ;;  %v682_v20 = vadd.f32 -0.25, %v274_v4  ;;  %v67_v59 = vld [vmem:[#allocation2 + $0x98] sm:$0xff] }
  0x6c   :  { %v522_v21 = vsel %vm330_vm6, %v394_v5, %v674_v6  ;;  %v286_v22 = vand.u32 2147483647, %v222_v63  ;;  %v290_v23 = vand.u32 2147483647, %v226_v8  ;;  %vm338_vm8 = vcmp.lt.f32.partialorder %v274_v4, 0.5  ;;  %v71_v60 = vld [vmem:[#allocation2 + $0xb8] sm:$0xff] }
  0x6d   :  { %v594_v24 = vadd.f32 %v593_v17, %v518_v14  ;;  %v294_v25 = vand.u32 2147483647, %v230_v9  ;;  %v406_v26 = vmul.f32 %v278_v11, %v278_v11  ;;  %v686_v27 = vadd.f32 -0.25, %v278_v11  ;;  %v131_v61 = vld [vmem:[#allocation5 + $0x98] sm:$0xff] }
  0x6e   :  { %v526_v28 = vsel %vm334_vm7, %v398_v12, %v678_v13  ;;  %v298_v32 = vand.u32 2147483647, %v234_v15  ;;  %v302_v34 = vand.u32 2147483647, %v238_v16  ;;  %vm342_vm9 = vcmp.lt.f32.partialorder %v278_v11, 0.5  ;;  %v135_v0 = vld [vmem:[#allocation5 + $0xb8] sm:$0xff] }
  0x6f   :  { %v595_v36 = vadd.f32 %v594_v24, %v522_v21  ;;  %vm346_vm10 = vcmp.lt.f32.partialorder %v282_v18, 0.5  ;;  %v410_v38 = vmul.f32 %v282_v18, %v282_v18  ;;  %v690_v39 = vadd.f32 -0.25, %v282_v18  ;;  %v75_v12 = vld [vmem:[#allocation2 + $0xd8] sm:$0xff] }
  0x70   :  { %v530_v40 = vsel %vm338_vm8, %v402_v19, %v682_v20  ;;  %vm350_vm11 = vcmp.lt.f32.partialorder %v286_v22, 0.5  ;;  %vm354_vm12 = vcmp.lt.f32.partialorder %v290_v23, 0.5  ;;  %v414_v35 = vmul.f32 %v286_v22, %v286_v22  ;;  %v139_v13 = vld [vmem:[#allocation5 + $0xd8] sm:$0xff] }
  0x71   :  { %v596_v33 = vadd.f32 %v595_v36, %v526_v28  ;;  %v694_v43 = vadd.f32 -0.25, %v286_v22  ;;  %v534_v44 = vsel %vm342_vm9, %v406_v26, %v686_v27  ;;  %v179_v47 = vsub.f32 %v51_v29, %v115_v31  ;;  %v79_v16 = vld [vmem:[#allocation2 + $0xf8] sm:$0xff] }
  0x72   :  { %v183_v48 = vsub.f32 %v55_v30, %v119_v37  ;;  %vm358_vm13 = vcmp.lt.f32.partialorder %v294_v25, 0.5  ;;  %v418_v49 = vmul.f32 %v290_v23, %v290_v23  ;;  %v422_v50 = vmul.f32 %v294_v25, %v294_v25  ;;  %v143_v17 = vld [vmem:[#allocation5 + $0xf8] sm:$0xff] }
  0x73   :  { %v597_v51 = vadd.f32 %v596_v33, %v530_v40  ;;  %v698_v52 = vadd.f32 -0.25, %v290_v23  ;;  %v702_v53 = vadd.f32 -0.25, %v294_v25  ;;  %v538_v54 = vsel %vm346_vm10, %v410_v38, %v690_v39  ;;  %v83_v24 = vld [vmem:[#allocation2 + $0x118] sm:$0xff] }
  0x74   :  { %v187_v55 = vsub.f32 %v59_v41, %v123_v42  ;;  %v426_v56 = vmul.f32 %v298_v32, %v298_v32  ;;  %v706_v57 = vadd.f32 -0.25, %v298_v32  ;;  %v191_v62 = vsub.f32 %v63_v45, %v127_v46  ;;  %v147_v25 = vld [vmem:[#allocation5 + $0x118] sm:$0xff] }
  0x75   :  { %v598_v58 = vadd.f32 %v597_v51, %v534_v44  ;;  %vm362_vm14 = vcmp.lt.f32.partialorder %v298_v32, 0.5  ;;  %v542_v63 = vsel %vm350_vm11, %v414_v35, %v694_v43  ;;  %v243_v1 = vand.u32 2147483647, %v179_v47  ;;  %v87_v36 = vld [vmem:[#allocation2 + $0x138] sm:$0xff] }
  0x76   :  { %v247_v2 = vand.u32 2147483647, %v183_v48  ;;  %vm366_vm15 = vcmp.lt.f32.partialorder %v302_v34, 0.5  ;;  %v430_v3 = vmul.f32 %v302_v34, %v302_v34  ;;  %v710_v4 = vadd.f32 -0.25, %v302_v34  ;;  %v151_v37 = vld [vmem:[#allocation5 + $0x138] sm:$0xff] }
  0x77   :  { %v599_v5 = vadd.f32 %v598_v58, %v538_v54  ;;  %v546_v6 = vsel %vm354_vm12, %v418_v49, %v698_v52  ;;  %v550_v7 = vsel %vm358_vm13, %v422_v50, %v702_v53  ;;  %v195_v8 = vsub.f32 %v67_v59, %v131_v61  ;;  %v91_v41 = vld [vmem:[#allocation2 + $0x158] sm:$0xff] }
  0x78   :  { %v251_v9 = vand.u32 2147483647, %v187_v55  ;;  %v554_v10 = vsel %vm362_vm14, %v426_v56, %v706_v57  ;;  %v199_v14 = vsub.f32 %v71_v60, %v135_v0  ;;  %v255_v15 = vand.u32 2147483647, %v191_v62  ;;  %v155_v42 = vld [vmem:[#allocation5 + $0x158] sm:$0xff] }
  0x79   :  { %v600_v11 = vadd.f32 %v599_v5, %v542_v63  ;;  %v371_v18 = vmul.f32 %v243_v1, %v243_v1  ;;  %v375_v19 = vmul.f32 %v247_v2, %v247_v2  ;;  %v651_v20 = vadd.f32 -0.25, %v243_v1  ;;  %v95_v50 = vld [vmem:[#allocation2 + $0x178] sm:$0xff] }
  0x7a   :  { %v655_v21 = vadd.f32 -0.25, %v247_v2  ;;  %v558_v22 = vsel %vm366_vm15, %v430_v3, %v710_v4  ;;  %vm307_vm0 = vcmp.lt.f32.partialorder %v243_v1, 0.5  ;;  %vm311_vm1 = vcmp.lt.f32.partialorder %v247_v2, 0.5  ;;  %v159_v51 = vld [vmem:[#allocation5 + $0x178] sm:$0xff] }
  0x7b   :  { %v601_v23 = vadd.f32 %v600_v11, %v546_v6  ;;  %v203_v26 = vsub.f32 %v75_v12, %v139_v13  ;;  %v259_v27 = vand.u32 2147483647, %v195_v8  ;;  %v379_v28 = vmul.f32 %v251_v9, %v251_v9  ;;  %v99_v58 = vld [vmem:[#allocation2 + $0x198] sm:$0xff] }
  0x7c   :  { %v659_v29 = vadd.f32 -0.25, %v251_v9  ;;  %v207_v31 = vsub.f32 %v79_v16, %v143_v17  ;;  %v263_v32 = vand.u32 2147483647, %v199_v14  ;;  %vm315_vm2 = vcmp.lt.f32.partialorder %v251_v9, 0.5  ;;  %v163_v59 = vld [vmem:[#allocation5 + $0x198] sm:$0xff] }
  0x7d   :  { %v602_v30 = vadd.f32 %v601_v23, %v550_v7  ;;  %v383_v38 = vmul.f32 %v255_v15, %v255_v15  ;;  %v663_v39 = vadd.f32 -0.25, %v255_v15  ;;  %v499_v34 = vsel %vm307_vm0, %v371_v18, %v651_v20  ;;  %v103_v2 = vld [vmem:[#allocation2 + $0x1b8] sm:$0xff] }
  0x7e   :  { %v503_v40 = vsel %vm311_vm1, %v375_v19, %v655_v21  ;;  %v211_v33 = vsub.f32 %v83_v24, %v147_v25  ;;  %vm319_vm3 = vcmp.lt.f32.partialorder %v255_v15, 0.5  ;;  %v267_v43 = vand.u32 2147483647, %v203_v26  ;;  %v167_v3 = vld [vmem:[#allocation5 + $0x1b8] sm:$0xff] }
  0x7f   :  { %v603_v35 = vadd.f32 %v602_v30, %v554_v10  ;;  %v387_v44 = vmul.f32 %v259_v27, %v259_v27  ;;  %v667_v45 = vadd.f32 -0.25, %v259_v27  ;;  %v507_v46 = vsel %vm315_vm2, %v379_v28, %v659_v29  ;;  %v107_v10 = vld [vmem:[#allocation2 + $0x1d8] sm:$0xff] }
  0x80   :  { %v215_v48 = vsub.f32 %v87_v36, %v151_v37  ;;  %vm323_vm4 = vcmp.lt.f32.partialorder %v259_v27, 0.5  ;;  %v605_v49 = vadd.f32 %v503_v40, %v499_v34  ;;  %v271_v52 = vand.u32 2147483647, %v207_v31  ;;  %v171_v11 = vld [vmem:[#allocation5 + $0x1d8] sm:$0xff] }
  0x81   :  { %v604_v47 = vadd.f32 %v603_v35, %v558_v22  ;;  %v391_v53 = vmul.f32 %v263_v32, %v263_v32  ;;  %v671_v54 = vadd.f32 -0.25, %v263_v32  ;;  %v511_v55 = vsel %vm319_vm3, %v383_v38, %v663_v39  ;;  %v111_v18 = vld [vmem:[#allocation2 + $0x1f8] sm:$0xff] }
  0x82   :  { %v219_v56 = vsub.f32 %v91_v41, %v155_v42  ;;  %vm327_vm5 = vcmp.lt.f32.partialorder %v263_v32, 0.5  ;;  %v606_v57 = vadd.f32 %v605_v49, %v507_v46  ;;  %v275_v60 = vand.u32 2147483647, %v211_v33  ;;  %v175_v19 = vld [vmem:[#allocation5 + $0x1f8] sm:$0xff] }
  0x83   :  { %v395_v61 = vmul.f32 %v267_v43, %v267_v43  ;;  %v675_v62 = vadd.f32 -0.25, %v267_v43  ;;  %v515_v63 = vsel %vm323_vm4, %v387_v44, %v667_v45  ;;  %630 = vst [vmem:[#allocation7 + $0x10] sm:$0xff] %v604_v47  ;;  %v223_v0 = vsub.f32 %v95_v50, %v159_v51 }
  0x84   :  { %vm331_vm6 = vcmp.lt.f32.partialorder %v267_v43, 0.5  ;;  %v607_v1 = vadd.f32 %v606_v57, %v511_v55  ;;  %v279_v4 = vand.u32 2147483647, %v215_v48  ;;  %v399_v5 = vmul.f32 %v271_v52, %v271_v52 }
  0x85   :  { %v679_v6 = vadd.f32 -0.25, %v271_v52  ;;  %v519_v7 = vsel %vm327_vm5, %v391_v53, %v671_v54  ;;  %v227_v8 = vsub.f32 %v99_v58, %v163_v59  ;;  %vm335_vm7 = vcmp.lt.f32.partialorder %v271_v52, 0.5 }
  0x86   :  { %v608_v9 = vadd.f32 %v607_v1, %v515_v63  ;;  %v283_v12 = vand.u32 2147483647, %v219_v56  ;;  %v403_v13 = vmul.f32 %v275_v60, %v275_v60  ;;  %v683_v14 = vadd.f32 -0.25, %v275_v60 }
  0x87   :  { %v523_v15 = vsel %vm331_vm6, %v395_v61, %v675_v62  ;;  %v231_v16 = vsub.f32 %v103_v2, %v167_v3  ;;  %vm339_vm8 = vcmp.lt.f32.partialorder %v275_v60, 0.5  ;;  %v287_v20 = vand.u32 2147483647, %v223_v0 }
  0x88   :  { %v609_v17 = vadd.f32 %v608_v9, %v519_v7  ;;  %v407_v21 = vmul.f32 %v279_v4, %v279_v4  ;;  %v687_v22 = vadd.f32 -0.25, %v279_v4  ;;  %v527_v23 = vsel %vm335_vm7, %v399_v5, %v679_v6 }
  0x89   :  { %v235_v24 = vsub.f32 %v107_v10, %v171_v11  ;;  %vm343_vm9 = vcmp.lt.f32.partialorder %v279_v4, 0.5  ;;  %v291_v26 = vand.u32 2147483647, %v227_v8  ;;  %v411_v27 = vmul.f32 %v283_v12, %v283_v12 }
  0x8a   :  { %v610_v25 = vadd.f32 %v609_v17, %v523_v15  ;;  %v691_v28 = vadd.f32 -0.25, %v283_v12  ;;  %v531_v29 = vsel %vm339_vm8, %v403_v13, %v683_v14  ;;  %v239_v30 = vsub.f32 %v111_v18, %v175_v19 }
  0x8b   :  { %vm347_vm10 = vcmp.lt.f32.partialorder %v283_v12, 0.5  ;;  %v295_v32 = vand.u32 2147483647, %v231_v16  ;;  %v415_v36 = vmul.f32 %v287_v20, %v287_v20  ;;  %v695_v37 = vadd.f32 -0.25, %v287_v20 }
  0x8c   :  { %v611_v31 = vadd.f32 %v610_v25, %v527_v23  ;;  %v535_v38 = vsel %vm343_vm9, %v407_v21, %v687_v22  ;;  %vm351_vm11 = vcmp.lt.f32.partialorder %v287_v20, 0.5  ;;  %v299_v34 = vand.u32 2147483647, %v235_v24 }
  0x8d   :  { %v419_v40 = vmul.f32 %v291_v26, %v291_v26  ;;  %v699_v35 = vadd.f32 -0.25, %v291_v26  ;;  %v539_v33 = vsel %vm347_vm10, %v411_v27, %v691_v28  ;;  %vm355_vm12 = vcmp.lt.f32.partialorder %v291_v26, 0.5 }
  0x8e   :  { %v612_v39 = vadd.f32 %v611_v31, %v531_v29  ;;  %v303_v42 = vand.u32 2147483647, %v239_v30  ;;  %v423_v43 = vmul.f32 %v295_v32, %v295_v32  ;;  %v703_v44 = vadd.f32 -0.25, %v295_v32 }
  0x8f   :  { %v543_v45 = vsel %vm351_vm11, %v415_v36, %v695_v37  ;;  %vm359_vm13 = vcmp.lt.f32.partialorder %v295_v32, 0.5  ;;  %v427_v47 = vmul.f32 %v299_v34, %v299_v34  ;;  %v707_v48 = vadd.f32 -0.25, %v299_v34 }
  0x90   :  { %v613_v41 = vadd.f32 %v612_v39, %v535_v38  ;;  %v547_v49 = vsel %vm355_vm12, %v419_v40, %v699_v35  ;;  %vm363_vm14 = vcmp.lt.f32.partialorder %v299_v34, 0.5  ;;  %v431_v51 = vmul.f32 %v303_v42, %v303_v42 }
  0x91   :  { %v711_v52 = vadd.f32 -0.25, %v303_v42  ;;  %v551_v53 = vsel %vm359_vm13, %v423_v43, %v703_v44  ;;  %vm367_vm15 = vcmp.lt.f32.partialorder %v303_v42, 0.5  ;;  %v555_v55 = vsel %vm363_vm14, %v427_v47, %v707_v48 }
  0x92   :  { %v614_v46 = vadd.f32 %v613_v41, %v539_v33 }
  0x93   :  { %v559_v57 = vsel %vm367_vm15, %v431_v51, %v711_v52 }
  0x94   :  { %v615_v50 = vadd.f32 %v614_v46, %v543_v45 }
  0x96   :  { %v616_v54 = vadd.f32 %v615_v50, %v547_v49 }
  0x98   :  { %v617_v56 = vadd.f32 %v616_v54, %v551_v53 }
  0x9a   :  { %v618_v58 = vadd.f32 %v617_v56, %v555_v55 }
  0x9c   :  { %v619_v59 = vadd.f32 %v618_v58, %v559_v57 }
  0x9e   :  { %631 = vst [vmem:[#allocation7 + $0x18] sm:$0xff] %v619_v59 }
  0x9f   :  { %769 = shalt.err (!%p766_p0)
}
  0xa0   :  { %641 = dma.vmem_to_hbm [thread:$0]  %s639_s1, 512, %s865_s2, [#allocation4]  }
  0xa1   :  { %782 = dma.done.wait [#allocation4], 512  }
  0xa2   :  { %783 = vsyncadd [#allocation4], 4294966784 }
  0xa3   :  { %645 = vsyncpa [#allocation3], 1 }
  0xa4   :  { %646 = vsyncpa [#allocation6], 1 }
  0xa5   :  { %647 = vsyncpa [#allocation4], 1 }

</bundles_post_ra>
